<compile_context>
chip_gen: v7x
topology: tpu7x:2x2x1
jax: 0.10.0
libtpu: 0.0.40
codegen_flags: <defaults>
</compile_context>

<pallas_src>
import jax
import jax.numpy as jnp
from jax.experimental import pallas as pl
from jax.experimental.pallas import tpu as pltpu


# ---------------------------------------------------------------------------
# Kernel
# ---------------------------------------------------------------------------
def _srgnn_cell_kernel(
    a_ref,        # (2, T, N_pad) int8  stacked [A_in ; A_out] row tiles (edge counts)
    inv_ref,      # (T, 2)        f32   per-row 1/deg for [in, out] (0 if deg == 0)
    h_ref,        # (N_pad, D)    bf16  resident hidden states
    wg_ref,       # (2D, 3D)      bf16  folded GRU input weights [Wg_in ; Wg_out]
    bg_in_ref,    # (1, 3D)       f32   b_in  @ W_ih_a
    bg_out_ref,   # (1, 3D)       f32   b_out @ W_ih_b
    b_ih_ref,     # (1, 3D)       f32
    w_hh_ref,     # (D, 3D)       bf16
    b_hh_ref,     # (1, 3D)       f32
    out_ref,      # (T, D)        f32
):
    t, d = out_ref.shape
    n_pad = h_ref.shape[0]

    h_all = h_ref[...]                                          # bf16 (N_pad, D)
    row0 = pl.multiple_of(pl.program_id(0) * t, t)
    h_bf = h_ref[pl.ds(row0, t), :]                              # this tile's rows
    h = h_bf.astype(jnp.float32)

    # A (integer counts) @ h for both directions in one MXU stream (RHS staged once).
    a_bf = a_ref[...].astype(jnp.bfloat16).reshape(2 * t, n_pad)
    ah = jnp.dot(a_bf, h_all, preferred_element_type=jnp.float32)   # (2T, D) f32

    inv_in = inv_ref[:, 0:1]                                     # (T, 1) f32
    inv_out = inv_ref[:, 1:2]
    ah_in = ah[:t] * inv_in                                      # exact mean aggregation
    ah_out = ah[t:] * inv_out
    rs_in = (inv_in > 0.0).astype(jnp.float32)                   # 1 iff node has in-edges
    rs_out = (inv_out > 0.0).astype(jnp.float32)

    # gi with the per-direction linear layers folded into wg/bg: one K=2D matmul.
    ah_cat = jnp.concatenate([ah_in, ah_out], axis=-1).astype(jnp.bfloat16)  # (T, 2D)
    gi = (jnp.dot(ah_cat, wg_ref[...], preferred_element_type=jnp.float32)
          + rs_in * bg_in_ref[...] + rs_out * bg_out_ref[...] + b_ih_ref[...])
    gh = (jnp.dot(h_bf, w_hh_ref[...], preferred_element_type=jnp.float32)
          + b_hh_ref[...])

    # gate slices fall on multiples of the padded D (lane-aligned).
    i_r, i_i, i_n = gi[:, :d], gi[:, d:2 * d], gi[:, 2 * d:]
    h_r, h_i, h_n = gh[:, :d], gh[:, d:2 * d], gh[:, 2 * d:]

    reset_gate = jax.nn.sigmoid(i_r + h_r)
    input_gate = jax.nn.sigmoid(i_i + h_i)
    new_gate = jnp.tanh(i_n + reset_gate * h_n)
    out_ref[...] = (1.0 - input_gate) * h + input_gate * new_gate


# ---------------------------------------------------------------------------
# Plain-JAX glue
# ---------------------------------------------------------------------------
def _round_up(x, m):
    return (x + m - 1) // m * m


def _pad2(a, rows, cols):
    return jnp.pad(a, ((0, rows - a.shape[0]), (0, cols - a.shape[1])))


def _pad_gate_weight(w, d, d_pad):
    """w: [d, 3d] (columns = [r|i|n]) -> [d_pad, 3*d_pad], padded per gate."""
    w3 = w.reshape(d, 3, d)
    w3 = jnp.pad(w3, ((0, d_pad - d), (0, 0), (0, d_pad - d)))
    return w3.reshape(d_pad, 3 * d_pad)


def _pad_gate_bias(b, d, d_pad):
    b3 = jnp.pad(jnp.asarray(b).reshape(3, d), ((0, 0), (0, d_pad - d)))
    return b3.reshape(1, 3 * d_pad)


def _vmem_budget():
    """~3/4 of the per-core VMEM: ~48 MiB on v7x, ~96 MiB on v5e/v6e."""
    cap = 64 * 1024 * 1024
    try:
        info = pltpu.get_tpu_info()
        cap = int(getattr(info, "vmem_capacity_bytes", cap))
    except Exception:
        pass
    return (cap * 3) // 4


def _vmem_estimate_bytes(tile_n, n_pad, d_pad):
    a_stream = 2 * (2 * tile_n * n_pad) * 1          # int8 A block, double-buffered
    inv_stream = 2 * tile_n * 128 * 4                 # (T, 2) padded to one lane group
    out_stream = 2 * tile_n * d_pad * 4
    resident = (n_pad * d_pad * 2                     # h (bf16, single copy)
                + 2 * d_pad * 3 * d_pad * 2           # wg
                + d_pad * 3 * d_pad * 2               # w_hh
                + 4 * 3 * d_pad * 4)                  # biases
    scratch = 16 * tile_n * d_pad * 4                 # matmul / gating temporaries
    return a_stream + inv_stream + out_stream + resident + scratch


def _auto_tile_n(n, d_pad, budget):
    n_min_pad = _round_up(max(n, 32), 32)
    cap = min(512, n_min_pad)                          # ~85% of HBM roofline at 512
    if n_min_pad >= 64:                                # >= 2 tiles -> feed both v7x cores
        cap = min(cap, _round_up((n + 1) // 2, 32))
    tile = max(32, cap)
    while tile > 32 and _vmem_estimate_bytes(tile, _round_up(n, tile), d_pad) > budget:
        tile -= 32
    return tile


def srgnn_cell_forward(hidden, edge_index, params, *, tile_n=None):
    """hidden: [N, D] f32, edge_index: [2, E] i32."""
    n, d = hidden.shape
    d_pad = _round_up(d, 128)
    budget = _vmem_budget()
    if tile_n is None:
        tile_n = _auto_tile_n(n, d_pad, budget)
    assert tile_n % 32 == 0 and tile_n >= 32
    n_pad = _round_up(n, tile_n)
    n_tiles = n_pad // tile_n

    src, dst = edge_index[0], edge_index[1]
    # Unnormalized int8 edge counts, built directly in the streaming dtype.
    # slice 0: incoming conv (messages src -> dst); slice 1: flipped edges.
    a_counts = jnp.zeros((2, n_pad, n_pad), jnp.int8)
    a_counts = a_counts.at[0, dst, src].add(1)
    a_counts = a_counts.at[1, src, dst].add(1)
    deg = jnp.sum(a_counts, axis=2, dtype=jnp.float32)            # (2, n_pad)
    inv_deg = jnp.where(deg > 0, 1.0 / jnp.maximum(deg, 1.0), 0.0).T.astype(jnp.float32)

    h_bf = _pad2(hidden.astype(jnp.float32), n_pad, d_pad).astype(jnp.bfloat16)

    # PyTorch Linear stores weight as [out, in]; transpose so the kernel does x @ W,
    # then fold the per-direction linear layers into the GRU input projection.
    w_in_t = params["w_in"].T.astype(jnp.float32)                  # (d, d)
    w_out_t = params["w_out"].T.astype(jnp.float32)
    w_ih_t = params["w_ih"].T.astype(jnp.float32)                  # (2d, 3d)
    w_ih_a, w_ih_b = w_ih_t[:d], w_ih_t[d:]
    wg_in = w_in_t @ w_ih_a                                        # (d, 3d)
    wg_out = w_out_t @ w_ih_b
    bg_in_raw = params["b_in"].reshape(1, d).astype(jnp.float32) @ w_ih_a
    bg_out_raw = params["b_out"].reshape(1, d).astype(jnp.float32) @ w_ih_b

    wg = jnp.concatenate(
        [_pad_gate_weight(wg_in, d, d_pad), _pad_gate_weight(wg_out, d, d_pad)],
        axis=0).astype(jnp.bfloat16)                               # (2*d_pad, 3*d_pad)
    bg_in = _pad_gate_bias(bg_in_raw.reshape(-1), d, d_pad).astype(jnp.float32)
    bg_out = _pad_gate_bias(bg_out_raw.reshape(-1), d, d_pad).astype(jnp.float32)
    b_ih = _pad_gate_bias(params["b_ih"], d, d_pad).astype(jnp.float32)
    w_hh = _pad_gate_weight(params["w_hh"].T.astype(jnp.float32), d, d_pad
                            ).astype(jnp.bfloat16)
    b_hh = _pad_gate_bias(params["b_hh"], d, d_pad).astype(jnp.float32)

    def _res():   # whole array resident in VMEM, single copy (no double buffering)
        return pl.BlockSpec(memory_space=pltpu.MemorySpace.VMEM)

    in_specs = [
        pl.BlockSpec((2, tile_n, n_pad), lambda i: (0, i, 0)),     # A counts (int8)
        pl.BlockSpec((tile_n, 2), lambda i: (i, 0)),               # inv_deg
        _res(),   # h
        _res(),   # wg
        _res(),   # bg_in
        _res(),   # bg_out
        _res(),   # b_ih
        _res(),   # w_hh
        _res(),   # b_hh
    ]
    out_spec = pl.BlockSpec((tile_n, d_pad), lambda i: (i, 0))

    vmem_limit = int(max(32 * 1024 * 1024, min(budget, 110 * 1024 * 1024)))

    cost = pl.CostEstimate(
        flops=int(4 * n_pad * n_pad * d_pad + 18 * n_pad * d_pad * d_pad),
        transcendentals=int(3 * n_pad * d_pad),
        bytes_accessed=int(2 * n_pad * n_pad                        # int8 A
                           + n_pad * d_pad * (2 + 4)                # h in, out
                           + 9 * d_pad * d_pad * 2                  # weights
                           + n_pad * 2 * 4),                        # inv_deg
    )

    out_pad = pl.pallas_call(
        _srgnn_cell_kernel,
        out_shape=jax.ShapeDtypeStruct((n_pad, d_pad), jnp.float32),
        grid_spec=pltpu.PrefetchScalarGridSpec(
            num_scalar_prefetch=0,
            grid=(n_tiles,),
            in_specs=in_specs,
            out_specs=out_spec,
        ),
        compiler_params=pltpu.CompilerParams(
            dimension_semantics=("parallel",),
            vmem_limit_bytes=vmem_limit,
        ),
        cost_estimate=cost,
    )(a_counts, inv_deg, h_bf, wg, bg_in, bg_out, b_ih, w_hh, b_hh)

    return out_pad[:n, :d]


# ---------------------------------------------------------------------------
# Params + pure-JAX reference (f32) for a sanity check
# ---------------------------------------------------------------------------
def _init_params(key, dim):
    stdv = 1.0 / jnp.sqrt(jnp.float32(dim))
    ks = jax.random.split(key, 8)
    u = lambda k, shape: jax.random.uniform(k, shape, jnp.float32, -stdv, stdv)
    return {
        "w_in": u(ks[0], (dim, dim)),         "b_in": u(ks[1], (dim,)),
        "w_out": u(ks[2], (dim, dim)),        "b_out": u(ks[3], (dim,)),
        "w_ih": u(ks[4], (3 * dim, 2 * dim)), "b_ih": u(ks[5], (3 * dim,)),
        "w_hh": u(ks[6], (3 * dim, dim)),     "b_hh": u(ks[7], (3 * dim,)),
    }


def _reference(hidden, edge_index, params):
    n, _ = hidden.shape
    src, dst = edge_index[0], edge_index[1]

    def norm_adj(s, t):
        a = jnp.zeros((n, n), jnp.float32).at[t, s].add(1.0)
        deg = a.sum(axis=1, keepdims=True)
        return a / jnp.maximum(deg, 1.0)

    a_in = norm_adj(src, dst)
    a_out = norm_adj(dst, src)
    m_in = a_in @ (hidden @ params["w_in"].T + params["b_in"])
    m_out = a_out @ (hidden @ params["w_out"].T + params["b_out"])
    inputs = jnp.concatenate([m_in, m_out], axis=-1)
    gi = inputs @ params["w_ih"].T + params["b_ih"]
    gh = hidden @ params["w_hh"].T + params["b_hh"]
    i_r, i_i, i_n = jnp.split(gi, 3, axis=-1)
    h_r, h_i, h_n = jnp.split(gh, 3, axis=-1)
    r = jax.nn.sigmoid(i_r + h_r)
    z = jax.nn.sigmoid(i_i + h_i)
    ng = jnp.tanh(i_n + r * h_n)
    return (1.0 - z) * hidden + z * ng


if __name__ == "__main__":
    N, D, E = 40, 32, 120
    key = jax.random.PRNGKey(0)
    k_h, k_e, k_p = jax.random.split(key, 3)

    hidden = jax.random.normal(k_h, (N, D), jnp.float32)
    edge_index = jax.random.randint(k_e, (2, E), 0, N, jnp.int32)
    params = _init_params(k_p, D)

    # auto tile_n -> 32, N padded to 64, 2 grid steps: exercises tiling + padding.
    out = jax.block_until_ready(srgnn_cell_forward(hidden, edge_index, params))
    ref = _reference(hidden, edge_index, params)

    assert out.shape == (N, D)
    max_err = float(jnp.max(jnp.abs(out - ref)))
    # bf16 matmul operands (and bf16 h in the residual) with f32 accumulation.
    assert jnp.allclose(out, ref, atol=3e-2, rtol=3e-2), (
        f"mismatch vs reference (max abs err {max_err})")
    print("KERNEL_OK")
</pallas_src>

<mosaic_0001>
module attributes {stable_mosaic.version = 11 : i64} {
  func.func @_srgnn_cell_kernel(%arg0: i32, %arg1: memref<2x32x64xi8, #tpu.memory_space<vmem>>, %arg2: memref<32x2xf32, #tpu.memory_space<vmem>>, %arg3: memref<64x128xbf16, #tpu.memory_space<vmem>>, %arg4: memref<256x384xbf16, #tpu.memory_space<vmem>>, %arg5: memref<1x384xf32, #tpu.memory_space<vmem>>, %arg6: memref<1x384xf32, #tpu.memory_space<vmem>>, %arg7: memref<1x384xf32, #tpu.memory_space<vmem>>, %arg8: memref<128x384xbf16, #tpu.memory_space<vmem>>, %arg9: memref<1x384xf32, #tpu.memory_space<vmem>>, %arg10: memref<32x128xf32, #tpu.memory_space<vmem>>) attributes {dimension_semantics = [#tpu.dimension_semantics<parallel>], iteration_bounds = array<i64: 2>, scalar_prefetch = 0 : i64, scratch_operands = 0 : i64, tpu.core_type = #tpu.core_type<tc>, window_params = [{transform_indices = @transform_0, window_bounds = array<i64: 2, 32, 64>}, {transform_indices = @transform_1, window_bounds = array<i64: 32, 2>}, {pipeline_mode = #tpu.pipeline_mode<synchronous>, transform_indices = @transform_2, window_bounds = array<i64: 64, 128>}, {pipeline_mode = #tpu.pipeline_mode<synchronous>, transform_indices = @transform_3, window_bounds = array<i64: 256, 384>}, {pipeline_mode = #tpu.pipeline_mode<synchronous>, transform_indices = @transform_4, window_bounds = array<i64: 1, 384>}, {pipeline_mode = #tpu.pipeline_mode<synchronous>, transform_indices = @transform_5, window_bounds = array<i64: 1, 384>}, {pipeline_mode = #tpu.pipeline_mode<synchronous>, transform_indices = @transform_6, window_bounds = array<i64: 1, 384>}, {pipeline_mode = #tpu.pipeline_mode<synchronous>, transform_indices = @transform_7, window_bounds = array<i64: 128, 384>}, {pipeline_mode = #tpu.pipeline_mode<synchronous>, transform_indices = @transform_8, window_bounds = array<i64: 1, 384>}, {transform_indices = @transform_9, window_bounds = array<i64: 32, 128>}]} {
    %c0 = arith.constant 0 : index
    %c0_0 = arith.constant 0 : index
    %0 = vector.load %arg3[%c0, %c0_0] : memref<64x128xbf16, #tpu.memory_space<vmem>>, vector<64x128xbf16>
    %c32_i32 = arith.constant 32 : i32
    %1 = arith.muli %arg0, %c32_i32 : i32
    %2 = tpu.assume_multiple %1, 32 : i32
    %3 = arith.index_cast %2 : i32 to index
    %c0_1 = arith.constant 0 : index
    %4 = vector.load %arg3[%3, %c0_1] : memref<64x128xbf16, #tpu.memory_space<vmem>>, vector<32x128xbf16>
    %5 = arith.extf %4 : vector<32x128xbf16> to vector<32x128xf32>
    %c0_2 = arith.constant 0 : index
    %c0_3 = arith.constant 0 : index
    %c0_4 = arith.constant 0 : index
    %6 = vector.load %arg1[%c0_2, %c0_3, %c0_4] : memref<2x32x64xi8, #tpu.memory_space<vmem>>, vector<2x32x64xi8>
    %7 = arith.sitofp %6 : vector<2x32x64xi8> to vector<2x32x64xbf16>
    %8 = vector.shape_cast %7 : vector<2x32x64xbf16> to vector<64x64xbf16>
    %cst = arith.constant dense<0.000000e+00> : vector<64x128xf32>
    %9 = tpu.matmul %8, %0, %cst {dimension_numbers = #tpu.dot_dimension_numbers<[1], [0], [0], [1], [0, 0, 1, 1], [], []>} : vector<64x64xbf16>, vector<64x128xbf16>, vector<64x128xf32> -> vector<64x128xf32>
    %c0_5 = arith.constant 0 : index
    %c0_6 = arith.constant 0 : index
    %10 = vector.load %arg2[%c0_5, %c0_6] : memref<32x2xf32, #tpu.memory_space<vmem>>, vector<32x1xf32>
    %c0_7 = arith.constant 0 : index
    %c1 = arith.constant 1 : index
    %11 = vector.load %arg2[%c0_7, %c1] : memref<32x2xf32, #tpu.memory_space<vmem>>, vector<32x1xf32>
    %12 = vector.extract_strided_slice %9 {offsets = [0, 0], sizes = [32, 128], strides = [1, 1]} : vector<64x128xf32> to vector<32x128xf32>
    %13 = vector.broadcast %10 : vector<32x1xf32> to vector<32x128xf32>
    %14 = arith.mulf %12, %13 : vector<32x128xf32>
    %15 = vector.extract_strided_slice %9 {offsets = [32, 0], sizes = [32, 128], strides = [1, 1]} : vector<64x128xf32> to vector<32x128xf32>
    %16 = vector.broadcast %11 : vector<32x1xf32> to vector<32x128xf32>
    %17 = arith.mulf %15, %16 : vector<32x128xf32>
    %cst_8 = arith.constant 0.000000e+00 : f32
    %18 = vector.broadcast %cst_8 : f32 to vector<32x1xf32>
    %19 = arith.cmpf ogt, %10, %18 : vector<32x1xf32>
    %20 = arith.extui %19 : vector<32x1xi1> to vector<32x1xi32>
    %21 = arith.sitofp %20 : vector<32x1xi32> to vector<32x1xf32>
    %cst_9 = arith.constant 0.000000e+00 : f32
    %22 = vector.broadcast %cst_9 : f32 to vector<32x1xf32>
    %23 = arith.cmpf ogt, %11, %22 : vector<32x1xf32>
    %24 = arith.extui %23 : vector<32x1xi1> to vector<32x1xi32>
    %25 = arith.sitofp %24 : vector<32x1xi32> to vector<32x1xf32>
    %26 = tpu.concatenate %14, %17 in 1 : vector<32x128xf32>, vector<32x128xf32> -> vector<32x256xf32>
    %27 = arith.truncf %26 : vector<32x256xf32> to vector<32x256xbf16>
    %c0_10 = arith.constant 0 : index
    %c0_11 = arith.constant 0 : index
    %28 = vector.load %arg4[%c0_10, %c0_11] : memref<256x384xbf16, #tpu.memory_space<vmem>>, vector<256x384xbf16>
    %cst_12 = arith.constant dense<0.000000e+00> : vector<32x384xf32>
    %29 = tpu.matmul %27, %28, %cst_12 {dimension_numbers = #tpu.dot_dimension_numbers<[1], [0], [0], [1], [0, 0, 1, 1], [], []>} : vector<32x256xbf16>, vector<256x384xbf16>, vector<32x384xf32> -> vector<32x384xf32>
    %c0_13 = arith.constant 0 : index
    %c0_14 = arith.constant 0 : index
    %30 = vector.load %arg5[%c0_13, %c0_14] : memref<1x384xf32, #tpu.memory_space<vmem>>, vector<1x384xf32>
    %31 = vector.broadcast %21 : vector<32x1xf32> to vector<32x384xf32>
    %32 = vector.broadcast %30 : vector<1x384xf32> to vector<32x384xf32>
    %33 = arith.mulf %31, %32 : vector<32x384xf32>
    %34 = arith.addf %29, %33 : vector<32x384xf32>
    %c0_15 = arith.constant 0 : index
    %c0_16 = arith.constant 0 : index
    %35 = vector.load %arg6[%c0_15, %c0_16] : memref<1x384xf32, #tpu.memory_space<vmem>>, vector<1x384xf32>
    %36 = vector.broadcast %25 : vector<32x1xf32> to vector<32x384xf32>
    %37 = vector.broadcast %35 : vector<1x384xf32> to vector<32x384xf32>
    %38 = arith.mulf %36, %37 : vector<32x384xf32>
    %39 = arith.addf %34, %38 : vector<32x384xf32>
    %c0_17 = arith.constant 0 : index
    %c0_18 = arith.constant 0 : index
    %40 = vector.load %arg7[%c0_17, %c0_18] : memref<1x384xf32, #tpu.memory_space<vmem>>, vector<1x384xf32>
    %41 = vector.broadcast %40 : vector<1x384xf32> to vector<32x384xf32>
    %42 = arith.addf %39, %41 : vector<32x384xf32>
    %c0_19 = arith.constant 0 : index
    %c0_20 = arith.constant 0 : index
    %43 = vector.load %arg8[%c0_19, %c0_20] : memref<128x384xbf16, #tpu.memory_space<vmem>>, vector<128x384xbf16>
    %cst_21 = arith.constant dense<0.000000e+00> : vector<32x384xf32>
    %44 = tpu.matmul %4, %43, %cst_21 {dimension_numbers = #tpu.dot_dimension_numbers<[1], [0], [0], [1], [0, 0, 1, 1], [], []>} : vector<32x128xbf16>, vector<128x384xbf16>, vector<32x384xf32> -> vector<32x384xf32>
    %c0_22 = arith.constant 0 : index
    %c0_23 = arith.constant 0 : index
    %45 = vector.load %arg9[%c0_22, %c0_23] : memref<1x384xf32, #tpu.memory_space<vmem>>, vector<1x384xf32>
    %46 = vector.broadcast %45 : vector<1x384xf32> to vector<32x384xf32>
    %47 = arith.addf %44, %46 : vector<32x384xf32>
    %48 = vector.extract_strided_slice %42 {offsets = [0, 0], sizes = [32, 128], strides = [1, 1]} : vector<32x384xf32> to vector<32x128xf32>
    %49 = vector.extract_strided_slice %42 {offsets = [0, 128], sizes = [32, 128], strides = [1, 1]} : vector<32x384xf32> to vector<32x128xf32>
    %50 = vector.extract_strided_slice %42 {offsets = [0, 256], sizes = [32, 128], strides = [1, 1]} : vector<32x384xf32> to vector<32x128xf32>
    %51 = vector.extract_strided_slice %47 {offsets = [0, 0], sizes = [32, 128], strides = [1, 1]} : vector<32x384xf32> to vector<32x128xf32>
    %52 = vector.extract_strided_slice %47 {offsets = [0, 128], sizes = [32, 128], strides = [1, 1]} : vector<32x384xf32> to vector<32x128xf32>
    %53 = vector.extract_strided_slice %47 {offsets = [0, 256], sizes = [32, 128], strides = [1, 1]} : vector<32x384xf32> to vector<32x128xf32>
    %54 = arith.addf %48, %51 : vector<32x128xf32>
    %55 = arith.negf %54 : vector<32x128xf32>
    %56 = math.exp %55 : vector<32x128xf32>
    %cst_24 = arith.constant 1.000000e+00 : f32
    %57 = vector.broadcast %cst_24 : f32 to vector<32x128xf32>
    %58 = arith.addf %57, %56 : vector<32x128xf32>
    %59 = arith.divf %57, %58 : vector<32x128xf32>
    %60 = arith.addf %49, %52 : vector<32x128xf32>
    %61 = arith.negf %60 : vector<32x128xf32>
    %62 = math.exp %61 : vector<32x128xf32>
    %cst_25 = arith.constant 1.000000e+00 : f32
    %63 = vector.broadcast %cst_25 : f32 to vector<32x128xf32>
    %64 = arith.addf %63, %62 : vector<32x128xf32>
    %65 = arith.divf %63, %64 : vector<32x128xf32>
    %66 = arith.mulf %59, %53 : vector<32x128xf32>
    %67 = arith.addf %50, %66 : vector<32x128xf32>
    %68 = math.tanh %67 : vector<32x128xf32>
    %cst_26 = arith.constant 1.000000e+00 : f32
    %69 = vector.broadcast %cst_26 : f32 to vector<32x128xf32>
    %70 = arith.subf %69, %65 : vector<32x128xf32>
    %71 = arith.mulf %70, %5 : vector<32x128xf32>
    %72 = arith.mulf %65, %68 : vector<32x128xf32>
    %73 = arith.addf %71, %72 : vector<32x128xf32>
    %c0_27 = arith.constant 0 : index
    %c0_28 = arith.constant 0 : index
    %74 = vector.load %arg10[%c0_27, %c0_28] : memref<32x128xf32, #tpu.memory_space<vmem>>, vector<32x128xf32>
    tpu.vector_store %arg10[%c0_27, %c0_28], %73 {strides = array<i32>} : memref<32x128xf32, #tpu.memory_space<vmem>>, vector<32x128xf32>,
    return
  }
  func.func @transform_0(%arg0: i32) -> (i32, i32, i32) {
    %c0_i32 = arith.constant 0 : i32
    %c0_i32_0 = arith.constant 0 : i32
    %c0_i32_1 = arith.constant 0 : i32
    return %c0_i32, %arg0, %c0_i32_0 : i32, i32, i32
  }
  func.func @transform_1(%arg0: i32) -> (i32, i32) {
    %c0_i32 = arith.constant 0 : i32
    %c0_i32_0 = arith.constant 0 : i32
    return %arg0, %c0_i32 : i32, i32
  }
  func.func @transform_2(%arg0: i32) -> (i32, i32) {
    %c0_i32 = arith.constant 0 : i32
    %c0_i32_0 = arith.constant 0 : i32
    %c0_i32_1 = arith.constant 0 : i32
    return %c0_i32, %c0_i32_0 : i32, i32
  }
  func.func @transform_3(%arg0: i32) -> (i32, i32) {
    %c0_i32 = arith.constant 0 : i32
    %c0_i32_0 = arith.constant 0 : i32
    %c0_i32_1 = arith.constant 0 : i32
    return %c0_i32, %c0_i32_0 : i32, i32
  }
  func.func @transform_4(%arg0: i32) -> (i32, i32) {
    %c0_i32 = arith.constant 0 : i32
    %c0_i32_0 = arith.constant 0 : i32
    %c0_i32_1 = arith.constant 0 : i32
    return %c0_i32, %c0_i32_0 : i32, i32
  }
  func.func @transform_5(%arg0: i32) -> (i32, i32) {
    %c0_i32 = arith.constant 0 : i32
    %c0_i32_0 = arith.constant 0 : i32
    %c0_i32_1 = arith.constant 0 : i32
    return %c0_i32, %c0_i32_0 : i32, i32
  }
  func.func @transform_6(%arg0: i32) -> (i32, i32) {
    %c0_i32 = arith.constant 0 : i32
    %c0_i32_0 = arith.constant 0 : i32
    %c0_i32_1 = arith.constant 0 : i32
    return %c0_i32, %c0_i32_0 : i32, i32
  }
  func.func @transform_7(%arg0: i32) -> (i32, i32) {
    %c0_i32 = arith.constant 0 : i32
    %c0_i32_0 = arith.constant 0 : i32
    %c0_i32_1 = arith.constant 0 : i32
    return %c0_i32, %c0_i32_0 : i32, i32
  }
  func.func @transform_8(%arg0: i32) -> (i32, i32) {
    %c0_i32 = arith.constant 0 : i32
    %c0_i32_0 = arith.constant 0 : i32
    %c0_i32_1 = arith.constant 0 : i32
    return %c0_i32, %c0_i32_0 : i32, i32
  }
  func.func @transform_9(%arg0: i32) -> (i32, i32) {
    %c0_i32 = arith.constant 0 : i32
    %c0_i32_0 = arith.constant 0 : i32
    return %arg0, %c0_i32 : i32, i32
  }
}

</mosaic_0001>

<bundles_post_ra>
// kernel: tpu_custom_call.1
= control target key start
LH: loop header
LB: loop body
LE: loop exit
PB: predicated region body
PF: predicated region fallthrough
CT: control target
= control target key end

     0   :  { %14 = vsyncpa [#allocation4], 0  ;;  %s2678_s0 = inlined_call_operand.vmem [shape: s8[2,64,64], index: 0, kind: input, shape index: {}]   ;;  %s2679_s1 = inlined_call_operand.vmem [shape: f32[64,2], index: 1, kind: input, shape index: {}]   ;;  %s2680_s2 = inlined_call_operand.vmem [shape: bf16[64,128], index: 2, kind: input, shape index: {}]   ;;  %s2681_s3 = inlined_call_operand.hbm [shape: bf16[256,384], index: 3, kind: input, shape index: {}]   ;;  %s2682_s4 = inlined_call_operand.vmem [shape: f32[1,384], index: 4, kind: input, shape index: {}]   ;;  %s2683_s5 = inlined_call_operand.vmem [shape: f32[1,384], index: 5, kind: input, shape index: {}]   ;;  %s2684_s6 = inlined_call_operand.vmem [shape: f32[1,384], index: 6, kind: input, shape index: {}]   ;;  %s2685_s7 = inlined_call_operand.hbm [shape: bf16[128,384], index: 7, kind: input, shape index: {}]   ;;  %s2686_s8 = inlined_call_operand.vmem [shape: f32[1,384], index: 8, kind: input, shape index: {}]   ;;  %s2687_s9 = inlined_call_operand.hbm [shape: f32[64,128], index: 9, kind: output, shape index: {}]  }
   0x1   :  { %15 = vsyncpa [#allocation7], 0 }
   0x2   :  { %16 = vsyncpa [#allocation5], 0 }
   0x3   :  { %18 = vsyncpa [#allocation5 + $0x1], 0  ;;  %s2334_s30 = smov 0   ;;  %s2336_s10 = smov 0  }
   0x4   :  { %s2338_s11 = smov 0   ;;  %s2340_s12 = smov 0  }
   0x5 LB: > { %2695 = sst [smem:[#allocation12_spill]] %s2260_s30  ;;  %s2355_s13 = sadd.s32 4294967295, %s2272_s12   ;;  %s2272_s12 = sphi %s2340_s12, %s2714_s12   ;;  %s2268_s11 = sphi %s2338_s11, %s2718_s11   ;;  %s2264_s10 = sphi %s2336_s10, %s2717_s10   ;;  %s2260_s30 = sphi %s2334_s30, %s2716_s30  }
   0x6   : > { %s1670_s14 = sadd.s32 4294967294, %s2272_s12   ;;  %s2359_s15 = sadd.s32 1, %s2272_s12  }
   0x7   : > { %2696 = sst [smem:[#allocation13_spill]] %s2359_s15  ;;  %s31_s16 = sadd.s32 1, %s2268_s11 }
   0x8   : > { %s28_s17 = ssub.s32 %s2272_s12, %s2359_s15  ;;  %p38_p0 = scmp.ne.s32.totalorder %s2268_s11, %s2264_s10 }
   0x9   : > { %p29_p1 = scmp.eq.s32.totalorder %s28_s17, 0  ;;  %p39_p2 = scmp.eq.s32.totalorder %s2272_s12, 0 }
   0xa   : > { %p241_p3 = scmp.eq.s32.totalorder %s2355_s13, 1  ;;  %p246_p4 = scmp.ne.s32.totalorder %s2264_s10, %s2260_s30 }
   0xb   : > { %s2371_s18 = scalar_select %p29_p1, %s2268_s11, %s31_s16  }
   0xc   : > { %p2373_p5 = por %p39_p2, %p38_p0  ;;  %p2377_p6 = por %p241_p3, %p38_p0 }
   0xd   : > { %2697 = sst [smem:[#allocation14_spill]] %s2371_s18  ;;  %p247_p7 = scmp.eq.s32.totalorder %s1670_s14, 1 }
   0xe   : > { %s2698_s19 = scalar_select %p2373_p5, 1, 0 }
   0xf   : > { %s2699_s20 = scalar_select %p2377_p6, 1, 0 }
  0x10   : > { %p1671_p8 = scmp.ge.s32.totalorder %s2272_s12, 1  ;;  %p254_p9 = scmp.lt.s32.totalorder %s2272_s12, 3 }
  0x11   : > { %p2383_p10 = por %p247_p7, %p246_p4  ;;  %p2688_p11 = scmp.eq.s32.totalorder %s2355_s13, 0 }
  0x12   : > { %p2388_p12 = pnand %p1671_p8, %p254_p9  ;;  %s2274_s23 = smov [#allocation3]  }
  0x13   : > { %s2700_s21 = scalar_select %p2383_p10, 1, 0 }
  0x14   : > { %s2702_s22 = scalar_select %p2388_p12, 1, 0 }
  0x15   : > { %2701 = sst [smem:[#allocation15_spill]] %s2700_s21  ;;  %s269_s24 = sshll.u32 %s2274_s23, 4  ;;  %s270_s24 = int_to_ptr.vmem [resolvable:$true] %s269_s24 }
  0x16   : > { %p1918_p13 = pneg %p2388_p12  ;;  %s2275_s26 = smov [#allocation6]  }
  0x17   : > { %s291_s27 = sshll.u32 %s2275_s26, 4  ;;  %s2146_s14 = scalar_lea.hbm %s2681_s3, 6144  ;;  %s2400_s27 = int_to_ptr.vmem [resolvable:$true] %s291_s27 }
  0x18   : > { %p2396_p0 = pnand %p2688_p11, %p1918_p13  ;;  %p2147_p1 = scmp.ne.s32.totalorder %s2681_s3, %s2146_s14 }
  0x19   : > { %p2153_p7 = scmp.lt.u32.totalorder %s2146_s14, %s2681_s3 }
  0x1a   : > { %p2148_p2 = pneg %p2396_p0 }
  0x1c   : > { %p2149_p3 = pnand %p2148_p2, %p2147_p1 }
  0x1e   : > { %p2150_p4 = pneg %p2149_p3 }
  0x20   : > { %p2155_p8 = pnand %p2153_p7, %p2150_p4 }
  0x22   : > { %2158 = shalt.err (!%p2155_p8)
}
  0x23   : > { %s2159_s26 = scalar_lea.vmem %s270_s24, 6144  ;;  %p2167_p10 = scmp.lt.s32.totalorder %s270_s24, %s270_s24 }
  0x24   : > { %p2160_p9 = scmp.ne.s32.totalorder %s270_s24, %s2159_s26  ;;  %p2168_p6 = scmp.lt.s32.totalorder %s2159_s26, %s2159_s26 }
  0x26   : > { %p2162_p13 = pnand %p2160_p9, %p2148_p2  ;;  %p2169_p12 = por %p2168_p6, %p2167_p10 }
  0x28   : > { %p2163_p11 = pneg %p2162_p13 }
  0x2a   : > { %p2170_p5 = pnand %p2169_p12, %p2163_p11 }
  0x2c   : > { %2173 = shalt.err (!%p2170_p5)
}
  0x2d   : > { %s2276_s28 = smov 192   ;;  %s2277_s29 = smov 12  }
  0x2e   : > { %1921 = dma.hbm_to_vmem [thread:$0]  (!%p2396_p0), %s2681_s3, 6144, %s270_s24, [#allocation4], %s2276_s28, %s2276_s28, %s2277_s29  }
  0x2f   : > { %s2174_s23 = scalar_lea.hbm %s2685_s7, 3072 }
  0x30   : > { %p2175_p1 = scmp.ne.s32.totalorder %s2685_s7, %s2174_s23  ;;  %p2181_p10 = scmp.lt.u32.totalorder %s2174_s23, %s2685_s7 }
  0x32   : > { %p2177_p5 = pnand %p2175_p1, %p2148_p2 }
  0x34   : > { %p2178_p6 = pneg %p2177_p5 }
  0x36   : > { %p2183_p11 = pnand %p2181_p10, %p2178_p6 }
  0x38   : > { %2186 = shalt.err (!%p2183_p11)
}
  0x39   : > { %s2187_s24 = scalar_lea.vmem %s2400_s27, 3072  ;;  %p2195_p7 = scmp.lt.s32.totalorder %s2400_s27, %s2400_s27 }
  0x3a   : > { %p2188_p12 = scmp.ne.s32.totalorder %s2400_s27, %s2187_s24  ;;  %p2196_p8 = scmp.lt.s32.totalorder %s2187_s24, %s2187_s24 }
  0x3c   : > { %p2190_p3 = pnand %p2188_p12, %p2148_p2  ;;  %p2197_p9 = por %p2196_p8, %p2195_p7 }
  0x3e   : > { %p2191_p4 = pneg %p2190_p3 }
  0x40   : > { %p2198_p13 = pnand %p2197_p9, %p2191_p4 }
  0x42   : > { %2201 = shalt.err (!%p2198_p13)
}
  0x43   : > { %1924 = dma.hbm_to_vmem [thread:$0]  (!%p2396_p0), %s2685_s7, 3072, %s2400_s27, [#allocation7], %s2276_s28, %s2276_s28, %s2277_s29  }
  0x44   : > { %p1674_p1 = scmp.ge.s32.totalorder %s2272_s12, 2 }
  0x45   : > { %p2704_p2 = scmp.ne.s32.totalorder (!%p1674_p1), %s2698_s19, 0 }
  0x46   : > { %304 = sbr.rel (%p1674_p1) target bundleno = 84 (0x54), region = 44 }
  0x4d   : > { %307 = sbr.rel (!%p2704_p2) target bundleno = 84 (0x54), region = 48  ;;  %s309_s21 = sand.u32 (%p2704_p2), 1, %s2268_s11  }
  0x4e   : > { %s1676_s18 = sshll.u32 (%p2704_p2), %s2272_s12, 3  ;;  %s1675_s14 = sshll.u32 (%p2704_p2), %s309_s21, 4 }
  0x4f   : > { %s313_s17 = scalar_lea.vmem (%p2704_p2), %s2678_s0, %s1676_s18  ;;  %s311_s27 = scalar_lea.vmem (%p2704_p2), [#allocation2], %s1675_s14 }
  0x50   : > { %v343_v0 = vld [vmem:[%s313_s17] sm:$0xff] (%p2704_p2)  ;;  %v345_v1 = vld [vmem:[%s313_s17 + $0x10] sm:$0xff] (%p2704_p2) }
  0x51   : > { %344 = vst [vmem:[%s311_s27] sm:$0xff] (%p2704_p2), %v343_v0  ;;  %346 = vst [vmem:[%s311_s27 + $0x8] sm:$0xff] (%p2704_p2), %v345_v1 }
  0x54 PF: > { %p2705_p0 = scmp.ne.s32.totalorder %s2702_s22, 0 }
  0x55   : > { %s2462_s19 = sand.u32 (!%p2705_p0), 1, %s2264_s10   ;;  %p2706_p5 = scmp.eq.s32.totalorder (!%p2705_p0), %s2355_s13, 0 }
  0x56   : > { %364 = sbr.rel (%p2705_p0) target bundleno = 660 (0x294), region = 90  ;;  %s1678_s28 = sshll.u32 (!%p2705_p0), %s2462_s19, 4 }
  0x57   : > { %s2465_s29 = scalar_lea.vmem (!%p2705_p0), [#allocation2], %s1678_s28 }
  0x5d   : > { %2247 = dma.done.wait (%p2706_p5), [#allocation4], 6144   ;;  %p2707_p6 = pmov %p2706_p5 }
  0x5e   : > { %p2708_p10 = pmov %p2706_p5 }
  0x5f   : > { %2249 = vsyncadd (%p2707_p6), [#allocation4], 4294961152 }
  0x60   : > { %2251 = dma.done.wait (%p2708_p10), [#allocation7], 3072   ;;  %p2709_p11 = pmov %p2706_p5 }
  0x61   : > { %s1682_s22 = sshll.u32 %s2355_s13, 2  ;;  %v2278_v2 = vmov 1   ;;  %v2279_v3 = vmov 0   ;;  %v2002_v4 = vld [vmem:[%s2680_s2] sm:$0xff]   ;;  %v2003_v5 = vld [vmem:[%s2680_s2 + $0x8] sm:$0xff]   ;;  %v2004_v6 = vld [vmem:[%s2680_s2 + $0x10] sm:$0xff]  }
  0x62   : > { %2253 = vsyncadd (%p2709_p11), [#allocation7], 4294964224  ;;  %1975 = vset.pattern.permute.xlu0 %v2278_v2  ;;  %1976 = vset.pattern.permute.xlu1 %v2279_v3  ;;  %p416_p12 = scmp.lt.s32.totalorder %s1682_s22, 7  ;;  %v444_v7 = vld [vmem:[%s2465_s29] sm:$0xff]  ;;  %vm474_vm0 = vcmask 523264   ;;  %v2005_v11 = vld [vmem:[%s2680_s2 + $0x18] sm:$0xff]  }
  0x63   : > { %1832 = vmatprep.subr.bf16.mxu0 %v2002_v4  ;;  %v446_v9 = vunpack.c.l.s8.bf16 %v444_v7  ;;  %v2006_v12 = vld [vmem:[#allocation3 + $0x4] ss:$12 sps:$4 sm:$0xff]   ;;  %v2008_v13 = vld [vmem:[#allocation3] ss:$12 sps:$4 sm:$0xff]   ;;  %v2009_v14 = vld [vmem:[#allocation3 + $0x1c] ss:$12 sps:$4 sm:$0xff]   ;;  %v447_v20 = vunpack.c.h.s8.bf16 %v444_v7 }
  0x64   : > { %s2720_s22 = smov (!%p416_p12, %s1682_s22), 7  ;;  %1833 = vmatpush3.bf16.msra.mxu0 %v2002_v4  ;;  %v445_v15 = vld [vmem:[%s2465_s29 + $0x8] sm:$0xff]  ;;  %985 = vmatprep.subr.bf16.mxu1 %v2006_v12  ;;  %v2012_v19 = vld [vmem:[#allocation3 + $0x34] ss:$12 sps:$4 sm:$0xff]   ;;  %v2280_v22 = vmov 0.0   ;;  %s1684_s28 = sshll.u32 %s2355_s13, 5 }
  0x65   : > { %s1683_s23 = sshll.u32 %s2720_s22, 3  ;;  %1834 = vmatprep.subr.bf16.mxu0 %v2003_v5  ;;  %1840 = vmatprep.mubr.msk.bf16.mxu0 %vm474_vm0, %v446_v9  ;;  %v2011_v18 = vld [vmem:[#allocation3 + $0x18] ss:$12 sps:$4 sm:$0xff]   ;;  %v448_v21 = vunpack.c.l.s8.bf16 %v445_v15  ;;  %v2014_v25 = vld [vmem:[#allocation3 + $0x30] ss:$12 sps:$4 sm:$0xff]   ;;  %v449_v35 = vunpack.c.h.s8.bf16 %v445_v15  ;;  %s432_s29 = sshra.s32 %s1684_s28, 3 }
  0x66   : > { %s419_s14 = scalar_lea.vmem %s2679_s1, %s1683_s23  ;;  %986 = vmatpush1.bf16.msra.mxu1 %v2008_v13  ;;  %v2015_v28 = vld [vmem:[#allocation3 + $0x4c] ss:$12 sps:$4 sm:$0xff]   ;;  %v2017_v30 = vld [vmem:[#allocation3 + $0x48] ss:$12 sps:$4 sm:$0xff]   ;;  %v2018_v34 = vld [vmem:[#allocation3 + $0x64] ss:$12 sps:$4 sm:$0xff]  }
  0x67   : > { %v552_v8 = vld [vmem:[%s419_s14] sm:$0xff]  ;;  %v553_v10 = vld [vmem:[%s419_s14 + $0x8] sm:$0xff]  ;;  %v554_v16 = vld [vmem:[%s419_s14 + $0x10] sm:$0xff]  ;;  %987 = vmatprep.subr.bf16.mxu1 %v2009_v14  ;;  %s1685_s22 = sshll.u32 %s432_s29, 2  ;;  %s1681_s27 = sshll.u32 %s2462_s19, 5 }
  0x68   : > { %581 = vperm.xlu0 %1975, %v552_v8   ;;  %558 = vperm.xlu1 %1976, %v552_v8   ;;  %v555_v17 = vld [vmem:[%s419_s14 + $0x18] sm:$0xff]  ;;  %vm602_vm1 = vcmp.gt.f32.partialorder %v554_v16, 0.0  ;;  %vm600_vm3 = vcmp.gt.f32.partialorder %v552_v8, 0.0  ;;  %vm601_vm4 = vcmp.gt.f32.partialorder %v553_v10, 0.0  ;;  %v2033_v31 = vld [vmem:[#allocation3 + $0xc8] ss:$12 sps:$4 sm:$0xff]   ;;  %s2508_s24 = scalar_lea.vmem %s2680_s2, %s1685_s22 }
  0x69   : > { %1835 = vmatpush3.bf16.msra.mxu0 %v2003_v5  ;;  %vm603_vm2 = vcmp.gt.f32.partialorder %v555_v17, 0.0  ;;  %v1696_v23 = vsel %vm602_vm1, 1.0, %v2280_v22  ;;  %v1694_v26 = vsel %vm600_vm3, 1.0, %v2280_v22  ;;  %v1695_v27 = vsel %vm601_vm4, 1.0, %v2280_v22  ;;  %v2034_v33 = vld [vmem:[#allocation3 + $0x8] ss:$12 sps:$4 sm:$0xff]  }
  0x6a   : > { %1836 = vmatprep.subr.bf16.mxu0 %v2004_v6  ;;  %v1697_v24 = vsel %vm603_vm2, 1.0, %v2280_v22  ;;  %988 = vmatpush1.bf16.msra.mxu1 %v2011_v18  ;;  %v1980_v32 = vpack.i.bf16 %v1695_v27, %v1694_v26  ;;  %v2020_v36 = vld [vmem:[#allocation3 + $0x60] ss:$12 sps:$4 sm:$0xff]   ;;  %v2021_v39 = vld [vmem:[#allocation3 + $0x7c] ss:$12 sps:$4 sm:$0xff]   ;;  %s414_s28 = scalar_lea.vmem [#allocation8], %s1681_s27 }
  0x6b   : > { %989 = vmatprep.subr.bf16.mxu1 %v2012_v19  ;;  %v1985_v29 = vpack.i.bf16 %v1697_v24, %v1696_v23  ;;  %v2038_v37 = vld [vmem:[#allocation3 + $0xe0] ss:$12 sps:$4 sm:$0xff]   ;;  %v2043_v40 = vld [vmem:[#allocation3 + $0xf8] ss:$12 sps:$4 sm:$0xff]   ;;  %v2048_v44 = vld [vmem:[#allocation3 + $0x110] ss:$12 sps:$4 sm:$0xff]  }
  0x6c   : > { %585 = vperm.xlu0 %1975, %v553_v10   ;;  %563 = vperm.xlu1 %1976, %v553_v10   ;;  %v2039_v38 = vld [vmem:[#allocation3 + $0x20] ss:$12 sps:$4 sm:$0xff]   ;;  %v2044_v41 = vld [vmem:[#allocation3 + $0x38] ss:$12 sps:$4 sm:$0xff]   ;;  %v2026_v45 = vld [vmem:[#allocation3 + $0x90] ss:$12 sps:$4 sm:$0xff]  }
  0x6d   : > { %1837 = vmatpush3.bf16.msra.mxu0 %v2004_v6  ;;  %v2023_v42 = vld [vmem:[#allocation3 + $0x78] ss:$12 sps:$4 sm:$0xff]   ;;  %v2024_v43 = vld [vmem:[#allocation3 + $0x94] ss:$12 sps:$4 sm:$0xff]   ;;  %v2049_v47 = vld [vmem:[#allocation3 + $0x50] ss:$12 sps:$4 sm:$0xff]  }
  0x6e   : > { %1838 = vmatprep.subr.bf16.mxu0 %v2005_v11  ;;  %990 = vmatpush1.bf16.msra.mxu1 %v2014_v25  ;;  %v2027_v46 = vld [vmem:[#allocation3 + $0xac] ss:$12 sps:$4 sm:$0xff]   ;;  %v2029_v48 = vld [vmem:[#allocation3 + $0xa8] ss:$12 sps:$4 sm:$0xff]   ;;  %v2030_v49 = vld [vmem:[#allocation3 + $0xc4] ss:$12 sps:$4 sm:$0xff]  }
  0x6f   : > { %991 = vmatprep.subr.bf16.mxu1 %v2015_v28  ;;  %v2032_v50 = vld [vmem:[#allocation3 + $0xc0] ss:$12 sps:$4 sm:$0xff]   ;;  %v2035_v51 = vld [vmem:[#allocation3 + $0xdc] ss:$12 sps:$4 sm:$0xff]   ;;  %v2037_v52 = vld [vmem:[#allocation3 + $0xd8] ss:$12 sps:$4 sm:$0xff]  }
  0x70   : > { %589 = vperm.xlu0 %1975, %v554_v16   ;;  %1977 = vset.pattern.permute.xlu1 %v2278_v2  ;;  %v2040_v53 = vld [vmem:[#allocation3 + $0xf4] ss:$12 sps:$4 sm:$0xff]   ;;  %v2042_v54 = vld [vmem:[#allocation3 + $0xf0] ss:$12 sps:$4 sm:$0xff]   ;;  %v2045_v55 = vld [vmem:[#allocation3 + $0x10c] ss:$12 sps:$4 sm:$0xff]  }
  0x71   : > { %593 = vperm.xlu1 %1977, %v555_v17   ;;  %1839 = vmatpush3.bf16.msra.mxu0 %v2005_v11  ;;  %v2047_v56 = vld [vmem:[#allocation3 + $0x108] ss:$12 sps:$4 sm:$0xff]   ;;  %v2050_v57 = vld [vmem:[#allocation3 + $0x124] ss:$12 sps:$4 sm:$0xff]   ;;  %v2052_v58 = vld [vmem:[#allocation3 + $0x120] ss:$12 sps:$4 sm:$0xff]  }
  0x72   : > { %1794 = vmatprep.subr.bf16.mxu0 %v2033_v31  ;;  %992 = vmatpush1.bf16.msra.mxu1 %v2017_v30  ;;  %v2053_v59 = vld [vmem:[#allocation3 + $0x128] ss:$12 sps:$4 sm:$0xff]   ;;  %v2057_v62 = vld [vmem:[#allocation3 + $0x138] ss:$12 sps:$4 sm:$0xff]   ;;  %v2058_v63 = vld [vmem:[#allocation3 + $0x140] ss:$12 sps:$4 sm:$0xff]  }
  0x73   : > { %993 = vmatprep.subr.bf16.mxu1 %v2018_v34  ;;  %v2054_v60 = vld [vmem:[#allocation3 + $0x68] ss:$12 sps:$4 sm:$0xff]   ;;  %v2059_v0 = vld [vmem:[#allocation3 + $0x80] ss:$12 sps:$4 sm:$0xff]   ;;  %v2063_v4 = vld [vmem:[#allocation3 + $0x158] ss:$12 sps:$4 sm:$0xff]  }
  0x74   : > { %1978 = vset.pattern.permute.xlu0 %v2279_v3  ;;  %1841 = vmatmul.mubr.msk.bf16.vlgmr.msra.gmra.mrb[0].mxu0 %vm474_vm0, %v447_v20  ;;  %v2055_v61 = vld [vmem:[#allocation3 + $0x13c] ss:$12 sps:$4 sm:$0xff]   ;;  %v2060_v1 = vld [vmem:[#allocation3 + $0x154] ss:$12 sps:$4 sm:$0xff]   ;;  %v2064_v5 = vld [vmem:[#allocation3 + $0x98] ss:$12 sps:$4 sm:$0xff]  }
  0x75   : > { %568 = vperm.xlu0 %1978, %v554_v16   ;;  %1844 = vmatprep.mubr.msk.bf16.mxu0 %vm474_vm0, %v448_v21  ;;  %v2065_v6 = vld [vmem:[#allocation3 + $0x16c] ss:$12 sps:$4 sm:$0xff]   ;;  %v2067_v7 = vld [vmem:[#allocation3 + $0x168] ss:$12 sps:$4 sm:$0xff]   ;;  %v2068_v8 = vld [vmem:[#allocation3 + $0x170] ss:$12 sps:$4 sm:$0xff]  }
  0x76   : > { %1979 = vset.pattern.permute.xlu1 %v2279_v3  ;;  %1795 = vmatpush3.bf16.msra.mxu0 %v2034_v33  ;;  %v2069_v9 = vld [vmem:[#allocation3 + $0xb0] ss:$12 sps:$4 sm:$0xff]   ;;  %v2091_v11 = vld [vmem:[#allocation6 + $0x8] ss:$12 sps:$4 sm:$0xff]   ;;  %s1785_s29 = sshll.u32 %s2355_s13, 9  ;;  %s1566_s22 = sshll.u32 %s414_s28, 4  ;;  %s2634_s22 = int_to_ptr.vmem [resolvable:$true] %s1566_s22 }
  0x77   : > { %573 = vperm.xlu1 %1979, %v555_v17   ;;  %1796 = vmatprep.subr.bf16.mxu0 %v2038_v37  ;;  %v2072_v10 = vld [vmem:[#allocation6 + $0x4] ss:$12 sps:$4 sm:$0xff]   ;;  %s1553_s30 = scalar_lea.sflag [#allocation5], %s2462_s19  ;;  %s2202_s15 = scalar_lea.vmem %s2634_s22, 512 }
  0x78   : > { %994 = vmatpush1.bf16.msra.mxu1 %v2020_v36  ;;  %p2203_p3 = scmp.ne.s32.totalorder %s2634_s22, %s2202_s15  ;;  %p2710_p4 = scmp.ne.s32.totalorder %s2699_s20, 0 }
  0x79   : > { %1986 = vperm.xlu0 %1978, %v1985_v29   ;;  %995 = vmatprep.subr.bf16.mxu1 %v2021_v39  ;;  %s2281_s13 = smov [#allocation8]  }
  0x7a   : > { %1797 = vmatpush3.bf16.msra.mxu0 %v2039_v38  ;;  %p2204_p7 = pnand %p2203_p3, %p2710_p4  ;;  %s2206_s21 = sshll.u32 %s2281_s13, 4  ;;  %s2207_s21 = int_to_ptr.vmem [resolvable:$false] %s2206_s21 }
  0x7b   : > { %1981 = vperm.xlu1 %1979, %v1980_v32   ;;  %1798 = vmatprep.subr.bf16.mxu0 %v2043_v40  ;;  %v2070_v40 = vld [vmem:[#allocation6] ss:$12 sps:$4 sm:$0xff]   ;;  %s2208_s18 = scalar_lea.vmem %s2207_s21, 1024  ;;  %p2209_p9 = scmp.lt.s32.totalorder %s2634_s22, %s2207_s21 }
  0x7c   : > { %1845 = vmatmul.mubr.msk.bf16.gmra.mrb[4].mxu0 %vm474_vm0, %v449_v35  ;;  %996 = vmatpush1.bf16.msra.mxu1 %v2023_v42  ;;  %v2095_v42 = vld [vmem:[#allocation6 + $0x20] ss:$12 sps:$4 sm:$0xff]   ;;  %p2205_p8 = pneg %p2204_p7  ;;  %p2210_p13 = scmp.lt.s32.totalorder %s2208_s18, %s2202_s15 }
  0x7d   : > { %1996 = vset.pattern.permute.xlu0 %v2278_v2  ;;  %997 = vmatprep.subr.bf16.mxu1 %v2024_v43  ;;  %v2073_v43 = vld [vmem:[#allocation6 + $0x18] ss:$12 sps:$4 sm:$0xff]  }
  0x7e   : > { %1998 = vperm.xlu0 %1996, %v1985_v29   ;;  %1799 = vmatpush3.bf16.msra.mxu0 %v2044_v41  ;;  %v2075_v41 = vld [vmem:[#allocation6 + $0x1c] ss:$12 sps:$4 sm:$0xff]   ;;  %p2211_p2 = por %p2210_p13, %p2209_p9 }
  0x7f   : > { %1990 = vset.pattern.permute.xlu1 %v2278_v2  ;;  %1800 = vmatprep.subr.bf16.mxu0 %v2048_v44  ;;  %v2062_v2 = vld [vmem:[#allocation3 + $0x150] ss:$12 sps:$4 sm:$0xff]   ;;  %v2078_v44 = vld [vmem:[#allocation6 + $0x34] ss:$12 sps:$4 sm:$0xff]  }
  0x80   : > { %1992 = vperm.xlu1 %1990, %v1980_v32   ;;  %998 = vmatpush1.bf16.msra.mxu1 %v2026_v45  ;;  %v2076_v45 = vld [vmem:[#allocation6 + $0x30] ss:$12 sps:$4 sm:$0xff]   ;;  %p2212_p0 = pnand %p2211_p2, %p2205_p8 }
  0x81   : > { %999 = vmatprep.subr.bf16.mxu1 %v2027_v46  ;;  %v2081_v46 = vld [vmem:[#allocation6 + $0x4c] ss:$12 sps:$4 sm:$0xff]  }
  0x82   : > { %1801 = vmatpush3.bf16.msra.mxu0 %v2049_v47  ;;  %v2511_v47 = vld [vmem:[%s2508_s24] sm:$0xff]  }
  0x83   : > { %1802 = vmatprep.subr.bf16.mxu0 %v2053_v59  ;;  %v2088_v59 = vld [vmem:[#allocation6 + $0x90] ss:$12 sps:$4 sm:$0xff]  }
  0x84   : > { %1000 = vmatpush1.bf16.msra.mxu1 %v2029_v48  ;;  %v2097_v48 = vld [vmem:[#allocation6 + $0x38] ss:$12 sps:$4 sm:$0xff]  }
  0x85   : > { %1001 = vmatprep.subr.bf16.mxu1 %v2030_v49  ;;  %v2098_v49 = vld [vmem:[#allocation6 + $0x50] ss:$12 sps:$4 sm:$0xff]  }
  0x86   : > { %1803 = vmatpush3.bf16.msra.mxu0 %v2054_v60  ;;  %v2094_v60 = vld [vmem:[#allocation6 + $0xac] ss:$12 sps:$4 sm:$0xff]  }
  0x87   : > { %1804 = vmatprep.subr.bf16.mxu0 %v2058_v63  ;;  %v2516_v63 = vld [vmem:[%s2508_s24 + $0x8] sm:$0xff]   ;;  %s2632_s24 = scalar_lea.hbm %s2687_s9, %s1785_s29 }
  0x88   : > { %1002 = vmatpush1.bf16.msra.mxu1 %v2032_v50  ;;  %v2079_v50 = vld [vmem:[#allocation6 + $0x48] ss:$12 sps:$4 sm:$0xff]  }
  0x89   : > { %1003 = vmatprep.subr.bf16.mxu1 %v2035_v51  ;;  %v2084_v51 = vld [vmem:[#allocation6 + $0x64] ss:$12 sps:$4 sm:$0xff]  }
  0x8a   : > { %1805 = vmatpush3.bf16.msra.mxu0 %v2059_v0 }
  0x8b   : > { %1806 = vmatprep.subr.bf16.mxu0 %v2063_v4 }
  0x8c   : > { %1004 = vmatpush1.bf16.msra.mxu1 %v2037_v52  ;;  %v2100_v52 = vld [vmem:[#allocation6 + $0x68] ss:$12 sps:$4 sm:$0xff]  }
  0x8d   : > { %1005 = vmatprep.subr.bf16.mxu1 %v2040_v53  ;;  %v2082_v53 = vld [vmem:[#allocation6 + $0x60] ss:$12 sps:$4 sm:$0xff]  }
  0x8e   : > { %1807 = vmatpush3.bf16.msra.mxu0 %v2064_v5  ;;  %v702_v5 = vlaneseq }
  0x8f   : > { %1808 = vmatprep.subr.bf16.mxu0 %v2068_v8 }
  0x90   : > { %1006 = vmatpush1.bf16.msra.mxu1 %v2042_v54  ;;  %v2087_v54 = vld [vmem:[#allocation6 + $0x7c] ss:$12 sps:$4 sm:$0xff]  }
  0x91   : > { %1007 = vmatprep.subr.bf16.mxu1 %v2045_v55  ;;  %v2101_v55 = vld [vmem:[#allocation6 + $0x80] ss:$12 sps:$4 sm:$0xff]  }
  0x92   : > { %1809 = vmatpush3.bf16.msra.mxu0 %v2069_v9  ;;  %v2526_v9 = vshrl.u32 %v702_v5, 7 }
  0x93   : > { %1848 = vmatprep.subr.bf16.mxu0 %v2091_v11 }
  0x94   : > { %1008 = vmatpush1.bf16.msra.mxu1 %v2047_v56  ;;  %v2085_v56 = vld [vmem:[#allocation6 + $0x78] ss:$12 sps:$4 sm:$0xff]  }
  0x95   : > { %1009 = vmatprep.subr.bf16.mxu1 %v2050_v57  ;;  %v2090_v57 = vld [vmem:[#allocation6 + $0x94] ss:$12 sps:$4 sm:$0xff]  }
  0x98   : > { %1010 = vmatpush1.bf16.msra.mxu1 %v2052_v58  ;;  %v2102_v58 = vld [vmem:[#allocation6 + $0x98] ss:$12 sps:$4 sm:$0xff]  }
  0x99   : > { %1011 = vmatprep.subr.bf16.mxu1 %v2055_v61  ;;  %v2103_v61 = vld [vmem:[#allocation6 + $0xb0] ss:$12 sps:$4 sm:$0xff]  }
  0x9c   : > { %1012 = vmatpush1.bf16.msra.mxu1 %v2057_v62  ;;  %v2092_v62 = vld [vmem:[#allocation6 + $0xa8] ss:$12 sps:$4 sm:$0xff]  }
  0x9d   : > { %1013 = vmatprep.subr.bf16.mxu1 %v2060_v1 }
  0xa0   : > { %1014 = vmatpush1.bf16.msra.mxu1 %v2062_v2 }
  0xa1   : > { %1015 = vmatprep.subr.bf16.mxu1 %v2065_v6 }
  0xa4   : > { %1016 = vmatpush1.bf16.msra.mxu1 %v2067_v7 }
  0xa5   : > { %1362 = vmatprep.subr.bf16.mxu1 %v2072_v10 }
  0xe7   : > { %v582_v12 = vpop.permute.xlu0 %581  ;;  %v559_v13 = vpop.permute.xlu1 %558 }
  0xeb   : > { %v586_v14 = vpop.permute.xlu0 %585  ;;  %v564_v15 = vpop.permute.xlu1 %563 }
  0xef   : > { %v590_v16 = vpop.permute.xlu0 %589 }
  0xf0   : > { %v594_v17 = vpop.permute.xlu1 %593 }
  0xf4   : > { %v569_v18 = vpop.permute.xlu0 %568 }
  0xf6   : > { %v574_v20 = vpop.permute.xlu1 %573 }
  0xfa   : > { %v1982_v8 = vpop.permute.xlu1 %1981 }
 0x147   : > { %v1842_v19 = vpop.f32.mrb[0].mxu0 }
 0x148   : > { %v521_v21 = vpop.f32.mrb[1].mxu0  ;;  %v578_v23 = vmul.f32 %v1842_v19, %v569_v18  ;;  %v1993_v18 = vpop.permute.xlu1 %1992 }
 0x149   : > { %v1843_v22 = vpop.f32.mrb[2].mxu0  ;;  %v576_v26 = vmul.f32 %v559_v13, %v521_v21  ;;  %v704_v13 = vsub.s32 0, %v2526_v9 }
 0x14a   : > { %v579_v24 = vmul.f32 %v1843_v22, %v574_v20  ;;  %v524_v25 = vpop.f32.mrb[3].mxu0  ;;  %v1987_v20 = vpop.permute.xlu0 %1986  ;;  %v2545_v22 = vunpack.i.l.bf16 %v1982_v8 }
 0x14b   : > { %v577_v27 = vmul.f32 %v564_v15, %v524_v25  ;;  %v2534_v15 = vld [vmem:[%s2682_s4] sm:$0x7] }
 0x14c   : > { %v614_v28 = vpack.c.bf16 %v579_v24, %v578_v23  ;;  %v705_v21 = vrot.slane %v2534_v15, %v704_v13  ;;  %v2548_v24 = vunpack.i.l.bf16 %v1993_v18 }
 0x14d   : > { %v612_v29 = vpack.c.bf16 %v577_v27, %v576_v26  ;;  %v2552_v27 = vunpack.i.h.bf16 %v1982_v8 }
 0x14f   : > { %v1846_v30 = vpop.f32.mrb[4].mxu0 }
 0x150   : > { %v537_v31 = vpop.f32.mrb[5].mxu0  ;;  %v598_v33 = vmul.f32 %v1846_v30, %v590_v16  ;;  %v708_v16 = vsub.s32 1, %v2526_v9 }
 0x151   : > { %v1847_v32 = vpop.f32.mrb[6].mxu0  ;;  %v596_v36 = vmul.f32 %v582_v12, %v537_v31 }
 0x152   : > { %v599_v34 = vmul.f32 %v1847_v32, %v594_v17  ;;  %v540_v35 = vpop.f32.mrb[7].mxu0  ;;  %v2540_v17 = vld [vmem:[%s2683_s5] sm:$0x7]  ;;  %v709_v25 = vrot.slane %v2534_v15, %v708_v16  ;;  %v1999_v32 = vpop.permute.xlu0 %1998 }
 0x153   : > { %v597_v37 = vmul.f32 %v586_v14, %v540_v35  ;;  %v1108_v23 = vrot.slane %v2540_v17, %v704_v13  ;;  %v1112_v26 = vrot.slane %v2540_v17, %v708_v16  ;;  %v720_v35 = vmul.f32 %v2552_v27, %v705_v21 }
 0x154   : > { %v615_v38 = vpack.c.bf16 %v599_v34, %v598_v33  ;;  %v718_v31 = vmul.f32 %v2545_v22, %v709_v25  ;;  %v2563_v34 = vld [vmem:[%s2684_s6] sm:$0x7] }
 0x155   : > { %v613_v39 = vpack.c.bf16 %v597_v37, %v596_v36  ;;  %v1120_v30 = vmul.f32 %v2548_v24, %v1108_v23  ;;  %v1121_v33 = vmul.f32 %v2548_v24, %v1112_v26  ;;  %v721_v37 = vmul.f32 %v2552_v27, %v709_v25 }
 0x157   : > { %1017 = vmatprep.mubr.bf16.mxu1 %v613_v39  ;;  %1070 = vmatprep.mubr.bf16.mxu0 %v613_v39  ;;  %v2569_v39 = vunpack.i.l.bf16 %v1987_v20 }
 0x158   : > { %1018 = vmatmul.mubr.bf16.vlgmr.msra.gmra.mrb[0].mxu1 %v612_v29  ;;  %1071 = vmatmul.mubr.bf16.vlgmr.msra.gmra.mrb[8].mxu0 %v612_v29  ;;  %v717_v29 = vmul.f32 %v2545_v22, %v705_v21 }
 0x159   : > { %1363 = vmatpush1.bf16.msra.mxu1 %v2070_v40  ;;  %1027 = vmatprep.mubr.bf16.mxu1 %v615_v38  ;;  %v2571_v40 = vunpack.i.l.bf16 %v1999_v32 }
 0x15a   : > { %1078 = vmatprep.mubr.bf16.mxu0 %v615_v38  ;;  %1364 = vmatprep.subr.bf16.mxu1 %v2075_v41  ;;  %v1149_v41 = vrot.slane %v2563_v34, %v704_v13 }
 0x15b   : > { %1849 = vmatpush3.bf16.msra.mxu0 %v2091_v11 }
 0x15c   : > { %1850 = vmatprep.subr.bf16.mxu0 %v2095_v42 }
 0x15d   : > { %1365 = vmatpush1.bf16.msra.mxu1 %v2073_v43  ;;  %v2577_v43 = vld [vmem:[%s2686_s8] sm:$0x7] }
 0x15e   : > { %1366 = vmatprep.subr.bf16.mxu1 %v2078_v44  ;;  %v1153_v44 = vrot.slane %v2563_v34, %v708_v16 }
 0x15f   : > { %1851 = vmatpush3.bf16.msra.mxu0 %v2095_v42  ;;  %v1868_v42 = vadd.f32 %v1120_v30, %v717_v29 }
 0x160   : > { %1028 = vmatmul.mubr.bf16.gmra.mrb[4].mxu1 %v614_v28  ;;  %1079 = vmatmul.mubr.bf16.gmra.mrb[12].mxu0 %v614_v28  ;;  %v2554_v28 = vunpack.i.h.bf16 %v1993_v18 }
 0x161   : > { %1367 = vmatpush1.bf16.msra.mxu1 %v2076_v45  ;;  %1394 = vmatprep.mubr.bf16.mxu1 %v2279_v3  ;;  %v1872_v45 = vadd.f32 %v1121_v33, %v718_v31 }
 0x162   : > { %1368 = vmatprep.subr.bf16.mxu1 %v2081_v46  ;;  %1852 = vmatprep.subr.bf16.mxu0 %v2097_v48  ;;  %v1123_v36 = vmul.f32 %v2554_v28, %v1108_v23  ;;  %v1124_v38 = vmul.f32 %v2554_v28, %v1112_v26  ;;  %v2580_v46 = vunpack.i.h.bf16 %v1987_v20 }
 0x163   : > { %1853 = vmatpush3.bf16.msra.mxu0 %v2097_v48  ;;  %1864 = vmatprep.mubr.bf16.mxu0 %v2511_v47  ;;  %v2582_v48 = vunpack.i.h.bf16 %v1999_v32 }
 0x164   : > { %1854 = vmatprep.subr.bf16.mxu0 %v2098_v49 }
 0x165   : > { %1369 = vmatpush1.bf16.msra.mxu1 %v2079_v50  ;;  %v1880_v50 = vadd.f32 %v1124_v38, %v721_v37 }
 0x166   : > { %1370 = vmatprep.subr.bf16.mxu1 %v2084_v51  ;;  %v723_v51 = vmul.f32 %v2569_v39, %v705_v21 }
 0x167   : > { %1855 = vmatpush3.bf16.msra.mxu0 %v2098_v49  ;;  %v1876_v49 = vadd.f32 %v1123_v36, %v720_v35 }
 0x168   : > { %1856 = vmatprep.subr.bf16.mxu0 %v2100_v52 }
 0x169   : > { %1371 = vmatpush1.bf16.msra.mxu1 %v2082_v53  ;;  %v1210_v53 = vrot.slane %v2577_v43, %v704_v13 }
 0x16a   : > { %1372 = vmatprep.subr.bf16.mxu1 %v2087_v54  ;;  %v1869_v54 = vadd.f32 %v1868_v42, %v1149_v41 }
 0x16b   : > { %1857 = vmatpush3.bf16.msra.mxu0 %v2100_v52  ;;  %v1126_v52 = vmul.f32 %v2571_v40, %v1108_v23 }
 0x16c   : > { %1858 = vmatprep.subr.bf16.mxu0 %v2101_v55 }
 0x16d   : > { %1373 = vmatpush1.bf16.msra.mxu1 %v2085_v56  ;;  %v1127_v56 = vmul.f32 %v2571_v40, %v1112_v26  ;;  %v1884_v5 = vadd.f32 %v1126_v52, %v723_v51 }
 0x16e   : > { %1374 = vmatprep.subr.bf16.mxu1 %v2090_v57  ;;  %v1214_v57 = vrot.slane %v2577_v43, %v708_v16 }
 0x16f   : > { %1859 = vmatpush3.bf16.msra.mxu0 %v2101_v55  ;;  %v724_v55 = vmul.f32 %v2569_v39, %v709_v25 }
 0x170   : > { %1860 = vmatprep.subr.bf16.mxu0 %v2102_v58 }
 0x171   : > { %1375 = vmatpush1.bf16.msra.mxu1 %v2088_v59  ;;  %v726_v59 = vmul.f32 %v2580_v46, %v705_v21 }
 0x172   : > { %1376 = vmatprep.subr.bf16.mxu1 %v2094_v60  ;;  %v1129_v60 = vmul.f32 %v2582_v48, %v1108_v23 }
 0x173   : > { %1861 = vmatpush3.bf16.msra.mxu0 %v2102_v58  ;;  %v1873_v58 = vadd.f32 %v1872_v45, %v1153_v44 }
 0x174   : > { %1862 = vmatprep.subr.bf16.mxu0 %v2103_v61 }
 0x175   : > { %1377 = vmatpush1.bf16.msra.mxu1 %v2092_v62  ;;  %v727_v62 = vmul.f32 %v2580_v46, %v709_v25  ;;  %v1874_v8 = vadd.f32 %v1873_v58, %v1214_v57 }
 0x177   : > { %1863 = vmatpush3.bf16.msra.mxu0 %v2103_v61  ;;  %v1877_v61 = vadd.f32 %v1876_v49, %v1149_v41 }
 0x178   : > { %1395 = vmatmul.mubr.bf16.vlgmr.msra.gmra.mrb[0].mxu1 %v2511_v47 }
 0x179   : > { %1404 = vmatprep.mubr.bf16.mxu1 %v2279_v3  ;;  %v1878_v13 = vadd.f32 %v1877_v61, %v1210_v53  ;;  %v712_v61 = vsub.s32 2, %v2526_v9 }
 0x17a   : > { %1865 = vmatmul.mubr.bf16.vlgmr.msra.gmra.mrb[16].mxu0 %v2516_v63 }
 0x180   : > { %1405 = vmatmul.mubr.bf16.gmra.mrb[4].mxu1 %v2516_v63 }
 0x22b   : > { %v1810_v0 = vpop.f32.mrb[8].mxu0 }
 0x22c   : > { %v1811_v1 = vpop.f32.mrb[9].mxu0 }
 0x22d   : > { %v2522_v2 = vadd.f32 %v1811_v1, %v1810_v0  ;;  %v1813_v4 = vpop.f32.mrb[10].mxu0  ;;  %v1130_v0 = vmul.f32 %v2582_v48, %v1112_v26  ;;  %v1881_v1 = vadd.f32 %v1880_v50, %v1153_v44  ;;  %v1885_v26 = vadd.f32 %v1884_v5, %v1149_v41 }
 0x22e   : > { %v1814_v6 = vpop.f32.mrb[11].mxu0 }
 0x22f   : > { %v2524_v7 = vadd.f32 %v1814_v6, %v1813_v4  ;;  %v1870_v4 = vadd.f32 %v1869_v54, %v1210_v53  ;;  %v1882_v20 = vadd.f32 %v1881_v1, %v1214_v57  ;;  %v1896_v21 = vadd.f32 %v1130_v0, %v727_v62 }
 0x230   : > { %v1886_v50 = vadd.f32 %v1885_v26, %v1210_v53 }
 0x231   : > { %v1897_v49 = vadd.f32 %v1896_v21, %v1153_v44  ;;  %v1218_v21 = vrot.slane %v2577_v43, %v712_v61 }
 0x233   : > { %v1816_v10 = vpop.f32.mrb[12].mxu0 }
 0x234   : > { %v1817_v11 = vpop.f32.mrb[13].mxu0 }
 0x235   : > { %v2528_v12 = vadd.f32 %v1817_v11, %v1816_v10  ;;  %v1819_v3 = vpop.f32.mrb[14].mxu0  ;;  %v1888_v10 = vadd.f32 %v1127_v56, %v724_v55 }
 0x236   : > { %v1820_v14 = vpop.f32.mrb[15].mxu0 }
 0x237   : > { %v2542_v19 = vadd.f32 %v1820_v14, %v1819_v3  ;;  %v1892_v14 = vadd.f32 %v1129_v60, %v726_v59  ;;  %v1889_v35 = vadd.f32 %v1888_v10, %v1153_v44  ;;  %v1898_v60 = vadd.f32 %v1897_v49, %v1214_v57 }
 0x238   : > { %v440_v49 = vunpack.c.l.bf16 %v2511_v47 }
 0x239   : > { %v1893_v38 = vadd.f32 %v1892_v14, %v1149_v41  ;;  %v1890_v52 = vadd.f32 %v1889_v35, %v1214_v57  ;;  %v1116_v57 = vrot.slane %v2540_v17, %v712_v61 }
 0x23b   : > { %v1894_v56 = vadd.f32 %v1893_v38, %v1210_v53  ;;  %v1125_v17 = vmul.f32 %v2554_v28, %v1116_v57 }
 0x24b   : > { %v1396_v6 = vpop.f32.mrb[0].mxu1 }
 0x24c   : > { %v1871_v11 = vadd.f32 %v1870_v4, %v1396_v6  ;;  %v1398_v3 = vpop.f32.mrb[1].mxu1 }
 0x24d   : > { %v1875_v16 = vadd.f32 %v1874_v8, %v1398_v3  ;;  %v1400_v18 = vpop.f32.mrb[2].mxu1  ;;  %v2594_v23 = vpop.f32.mrb[16].mxu0  ;;  %v713_v8 = vrot.slane %v2534_v15, %v712_v61  ;;  %v1122_v15 = vmul.f32 %v2548_v24, %v1116_v57 }
 0x24e   : > { %v1772_v29 = vmul.f32 -1.442695, %v1871_v11  ;;  %v1879_v25 = vadd.f32 %v1878_v13, %v1400_v18  ;;  %v1402_v30 = vpop.f32.mrb[3].mxu1  ;;  %v2596_v31 = vpop.f32.mrb[17].mxu0 }
 0x24f   : > { %v1776_v32 = vmul.f32 -1.442695, %v1875_v16  ;;  %v1883_v33 = vadd.f32 %v1882_v20, %v1402_v30  ;;  %v2598_v36 = vpop.f32.mrb[18].mxu0  ;;  %v719_v14 = vmul.f32 %v2545_v22, %v713_v8  ;;  %v722_v18 = vmul.f32 %v2552_v27, %v713_v8 }
 0x250   : > { %2106 = vpow2.f32 %v1772_v29  ;;  %v1773_v37 = vmul.f32 -1.442695, %v1879_v25  ;;  %v2600_v42 = vpop.f32.mrb[19].mxu0  ;;  %v1157_v27 = vrot.slane %v2563_v34, %v712_v61  ;;  %v1450_v35 = vadd.f32 %v2596_v31, %v1218_v21 }
 0x251   : > { %2108 = vpow2.f32 %v1776_v32  ;;  %v1777_v45 = vmul.f32 -1.442695, %v1883_v33  ;;  %v1073_v20 = vadd.f32 %v2522_v2, %v719_v14  ;;  %v1076_v25 = vadd.f32 %v2524_v7, %v722_v18 }
 0x252   : > { %2110 = vpow2.f32 %v1773_v37  ;;  %v725_v2 = vmul.f32 %v2569_v39, %v713_v8  ;;  %v1453_v28 = vadd.f32 %v2600_v42, %v1218_v21 }
 0x253   : > { %2112 = vpow2.f32 %v1777_v45  ;;  %v1406_v51 = vpop.f32.mrb[4].mxu1  ;;  %v1134_v32 = vadd.f32 %v1122_v15, %v1073_v20  ;;  %v1137_v43 = vadd.f32 %v1125_v17, %v1076_v25  ;;  %v1128_v45 = vmul.f32 %v2571_v40, %v1116_v57 }
 0x254   : > { %v1887_v54 = vadd.f32 %v1886_v50, %v1406_v51  ;;  %v1408_v55 = vpop.f32.mrb[5].mxu1  ;;  %v728_v50 = vmul.f32 %v2580_v46, %v713_v8  ;;  %v1081_v31 = vadd.f32 %v2528_v12, %v725_v2  ;;  %v1458_v12 = vadd.f32 %v2594_v23, %v1218_v21 }
 0x255   : > { %v1891_v58 = vadd.f32 %v1890_v52, %v1408_v55  ;;  %v1410_v59 = vpop.f32.mrb[6].mxu1  ;;  %v1163_v39 = vadd.f32 %v1157_v27, %v1134_v32  ;;  %v441_v55 = vunpack.c.h.bf16 %v2511_v47  ;;  %v442_v47 = vunpack.c.l.bf16 %v2516_v63 }
 0x256   : > { %v1774_v62 = vmul.f32 -1.442695, %v1887_v54  ;;  %v1895_v41 = vadd.f32 %v1894_v56, %v1410_v59  ;;  %v1412_v0 = vpop.f32.mrb[7].mxu1  ;;  %v1131_v54 = vmul.f32 %v2582_v48, %v1116_v57  ;;  %v1084_v40 = vadd.f32 %v2542_v19, %v728_v50 }
 0x257   : > { %v1778_v1 = vmul.f32 -1.442695, %v1891_v58  ;;  %v1899_v4 = vadd.f32 %v1898_v60, %v1412_v0  ;;  %v1166_v59 = vadd.f32 %v1157_v27, %v1137_v43  ;;  %v443_v8 = vunpack.c.h.bf16 %v2516_v63 }
 0x258   : > { %2114 = vpow2.f32 %v1774_v62  ;;  %v1775_v44 = vmul.f32 -1.442695, %v1895_v41  ;;  %v1140_v62 = vadd.f32 %v1128_v45, %v1081_v31 }
 0x259   : > { %2116 = vpow2.f32 %v1778_v1  ;;  %v1779_v5 = vmul.f32 -1.442695, %v1899_v4  ;;  %v1143_v1 = vadd.f32 %v1131_v54, %v1084_v40 }
 0x25a   : > { %v2107_v6 = vpop.eup %2106  ;;  %2118 = vpow2.f32 %v1775_v44  ;;  %v1169_v44 = vadd.f32 %v1157_v27, %v1140_v62 }
 0x25b   : > { %v2109_v10 = vpop.eup %2108  ;;  %v1480_v53 = vadd.f32 1.0, %v2107_v6  ;;  %2120 = vpow2.f32 %v1779_v5  ;;  %v1461_v5 = vadd.f32 %v2598_v36, %v1218_v21 }
 0x25c   : > { %v2111_v11 = vpop.eup %2110  ;;  %v1508_v9 = vadd.f32 1.0, %v2109_v10 }
 0x25d   : > { %v2113_v3 = vpop.eup %2112  ;;  %2122 = vrcp.f32 %v1480_v53  ;;  %v1481_v13 = vadd.f32 1.0, %v2111_v11  ;;  %v1172_v11 = vadd.f32 %v1157_v27, %v1143_v1 }
 0x25e   : > { %2124 = vrcp.f32 %v1508_v9  ;;  %v1509_v16 = vadd.f32 1.0, %v2113_v3 }
 0x25f   : > { %2126 = vrcp.f32 %v1481_v13 }
 0x260   : > { %2128 = vrcp.f32 %v1509_v16 }
 0x262   : > { %v2115_v29 = vpop.eup %2114 }
 0x263   : > { %v2117_v30 = vpop.eup %2116  ;;  %v1482_v26 = vadd.f32 1.0, %v2115_v29 }
 0x264   : > { %v2119_v22 = vpop.eup %2118  ;;  %v1510_v33 = vadd.f32 1.0, %v2117_v30 }
 0x265   : > { %v2121_v24 = vpop.eup %2120  ;;  %2130 = vrcp.f32 %v1482_v26  ;;  %v1483_v37 = vadd.f32 1.0, %v2119_v22 }
 0x266   : > { %2132 = vrcp.f32 %v1510_v33  ;;  %v1511_v38 = vadd.f32 1.0, %v2121_v24 }
 0x267   : > { %v2123_v7 = vpop.eup %2122  ;;  %2134 = vrcp.f32 %v1483_v37 }
 0x268   : > { %v2125_v34 = vpop.eup %2124  ;;  %2136 = vrcp.f32 %v1511_v38  ;;  %v1520_v51 = vmul.f32 %v2123_v7, %v1450_v35 }
 0x269   : > { %v2127_v52 = vpop.eup %2126  ;;  %v1532_v42 = vsub.f32 1.0, %v2125_v34 }
 0x26a   : > { %v2129_v56 = vpop.eup %2128  ;;  %v1524_v58 = vadd.f32 %v1520_v51, %v1163_v39  ;;  %v1521_v60 = vmul.f32 %v2127_v52, %v1453_v28 }
 0x26b   : > { %v1536_v46 = vmul.f32 %v1532_v42, %v440_v49  ;;  %v1533_v61 = vsub.f32 1.0, %v2129_v56 }
 0x26c   : > { %2138 = vtanh.f32 %v1524_v58  ;;  %v1525_v41 = vadd.f32 %v1521_v60, %v1166_v59 }
 0x26d   : > { %v1537_v0 = vmul.f32 %v1533_v61, %v441_v55 }
 0x26e   : > { %2140 = vtanh.f32 %v1525_v41 }
 0x26f   : > { %v2131_v48 = vpop.eup %2130 }
 0x270   : > { %v2133_v4 = vpop.eup %2132  ;;  %v1522_v19 = vmul.f32 %v2131_v48, %v1458_v12 }
 0x271   : > { %v2135_v6 = vpop.eup %2134  ;;  %v1534_v10 = vsub.f32 1.0, %v2133_v4 }
 0x272   : > { %v2137_v53 = vpop.eup %2136  ;;  %v1526_v23 = vadd.f32 %v1522_v19, %v1169_v44  ;;  %v1523_v57 = vmul.f32 %v2135_v6, %v1461_v5 }
 0x273   : > { %v1538_v9 = vmul.f32 %v1534_v10, %v442_v47  ;;  %v1535_v3 = vsub.f32 1.0, %v2137_v53 }
 0x274   : > { %2142 = vtanh.f32 %v1526_v23  ;;  %v1527_v13 = vadd.f32 %v1523_v57, %v1172_v11 }
 0x275   : > { %v1539_v14 = vmul.f32 %v1535_v3, %v443_v8 }
 0x276   : > { %v2139_v16 = vpop.eup %2138  ;;  %2144 = vtanh.f32 %v1527_v13 }
 0x277   : > { %v1540_v18 = vmul.f32 %v2139_v16, %v2125_v34 }
 0x278   : > { %v2141_v15 = vpop.eup %2140 }
 0x279   : > { %v1544_v36 = vadd.f32 %v1540_v18, %v1536_v46  ;;  %v1541_v20 = vmul.f32 %v2141_v15, %v2129_v56 }
 0x27b   : > { %1548 = vst [vmem:[%s414_s28] sm:$0xff] %v1544_v36  ;;  %v1545_v63 = vadd.f32 %v1541_v20, %v1537_v0 }
 0x27d   : > { %1549 = vst [vmem:[%s414_s28 + $0x8] sm:$0xff] %v1545_v63 }
 0x27e   : > { %v2143_v21 = vpop.eup %2142 }
 0x27f   : > { %v1542_v29 = vmul.f32 %v2143_v21, %v2133_v4 }
 0x280   : > { %v2145_v17 = vpop.eup %2144 }
 0x281   : > { %v1546_v25 = vadd.f32 %v1542_v29, %v1538_v9  ;;  %v1543_v30 = vmul.f32 %v2145_v17, %v2137_v53 }
 0x283   : > { %1550 = vst [vmem:[%s414_s28 + $0x10] sm:$0xff] %v1546_v25  ;;  %v1547_v26 = vadd.f32 %v1543_v30, %v1539_v14 }
 0x285   : > { %1551 = vst [vmem:[%s414_s28 + $0x18] sm:$0xff] %v1547_v26 }
 0x286   : > { %2215 = shalt.err (!%p2212_p0)
}
 0x287   : > { %s2216_s14 = scalar_lea.hbm %s2632_s24, 512  ;;  %s2220_s17 = scalar_lea.hbm %s2687_s9, 1024 }
 0x288   : > { %p2217_p5 = scmp.ne.s32.totalorder %s2632_s24, %s2216_s14  ;;  %p2221_p11 = scmp.lt.u32.totalorder %s2632_s24, %s2687_s9 }
 0x289   : > { %p2222_p12 = scmp.lt.u32.totalorder %s2220_s17, %s2216_s14  ;;  %p2224_p7 = scmp.lt.u32.totalorder %s2216_s14, %s2632_s24 }
 0x28a   : > { %p2218_p6 = pnand %p2217_p5, %p2710_p4 }
 0x28b   : > { %p2223_p3 = por %p2222_p12, %p2221_p11 }
 0x28c   : > { %p2219_p10 = pneg %p2218_p6 }
 0x28d   : > { %p2225_p8 = por %p2224_p7, %p2223_p3 }
 0x28f   : > { %p2226_p9 = pnand %p2225_p8, %p2219_p10 }
 0x291   : > { %2229 = shalt.err (!%p2226_p9)
}
 0x292   : > { %s2282_s29 = smov 128   ;;  %s2283_s23 = smov 8  }
 0x293   : > { %1916 = dma.vmem_to_hbm [thread:$0]  (%p2710_p4), %s2634_s22, 512, %s2632_s24, %s1553_s30, %s2282_s29, %s2282_s29, %s2283_s23  }
 0x294 PF: > { %s2711_s26 = sld [smem:[#allocation12_spill]]  ;;  %s2712_s15 = sld [smem:[#allocation15_spill]] }
 0x29a   : > { %s1581_s13 = sand.u32 1, %s2711_s26   ;;  %p2713_p13 = scmp.ne.s32.totalorder %s2712_s15, 0 }
 0x29b   : > { %s1582_s21 = scalar_lea.sflag [#allocation5], %s1581_s13 }
 0x29c   : > { %p1926_p2 = pnand %p1674_p1, %p2713_p13 }
 0x29e   : > { %2255 = dma.done.wait (!%p1926_p2), %s1582_s21, 512  }
 0x29f   : > { %2257 = vsyncadd (!%p1926_p2), %s1582_s21, 4294966784  ;;  %s2714_s12 = sld [smem:[#allocation13_spill]]  ;;  %s2715_s18 = sld [smem:[#allocation14_spill]] }
 0x2a0   : > { %s2716_s30 = smov %s2264_s10  ;;  %s2717_s10 = smov %s2268_s11 }
 0x2a5   : > { %p21_p0 = scmp.ge.s32.totalorder %s2714_s12, 4   ;;  %s2718_s11 = smov %s2715_s18 }
 0x2a7   :  { %23 = sbr.rel (!%p21_p0) target bundleno = 5 (0x5), region = 147 }
 0x2ae   :  { %1587 = vsyncpa [#allocation4], 1 }
 0x2af   :  { %1589 = vsyncpa [#allocation4 + $0x1], 1 }
 0x2b0   :  { %1590 = vsyncpa [#allocation7], 1 }
 0x2b1   :  { %1591 = vsyncpa [#allocation5], 1 }
 0x2b2   :  { %1593 = vsyncpa [#allocation5 + $0x1], 1 }

</bundles_post_ra>
